<compile_context>
chip_gen: v6e
topology: v6e:2x2x1
jax: 0.10.0
libtpu: 0.0.40
codegen_flags: <defaults>
</compile_context>

<pallas_src>
import numpy as np
import jax
import jax.numpy as jnp
from jax import lax
from jax.experimental import pallas as pl
from jax.experimental.pallas import tpu as pltpu

F32 = jnp.float32
EPS = 1e-5

BATCH = 2
C_IN = 4
C_OUT = 32
SEQ_LEN = 128
K_SIZE = 3          # Conv1d(kernel_size=3, padding=1, stride=1)
C_IN_PAD = 8        # sublane-aligned rows per tap in the im2col block


# ================================== kernel ===================================
def basic_block_kernel(x_ref, w_ref, sh_ref, o_ref, cols_ref):
    """Fused Conv1d(k=3, p=1) + folded BatchNorm1d(eval) + ReLU.

    x_ref   : (B, C_in, L)            native PyTorch NCW layout
    w_ref   : (C_out, K*C_IN_PAD)     BN-scale-folded conv weight, tap-major,
                                      zero-padded so each tap owns 8 sublanes
    sh_ref  : (C_out, 1)              shift = beta - mean*scale + bias*scale
    o_ref   : (B, C_out, L)           native NCW output
    cols_ref: (K*C_IN_PAD, B*L) VMEM  sublane-aligned im2col scratch
    """
    batch, c_in, seq = x_ref.shape

    # Boundary masks (conv zero-padding): lane 0 has no x[l-1], lane L-1 has
    # no x[l+1].  Built once, reused for every batch element.
    lane = lax.broadcasted_iota(jnp.int32, (c_in, seq), 1)
    keep_m1 = lane != 0
    keep_p1 = lane != seq - 1

    # Zero the scratch once so the padding rows (and any stale VMEM) are 0.
    cols_ref[...] = jnp.zeros_like(cols_ref)

    for b in range(batch):                       # static, B = 2
        xb = x_ref[b]                            # (C_in, L)
        x_m1 = jnp.where(keep_m1, jnp.roll(xb, 1, axis=1), 0.0)   # x[l-1]
        x_p1 = jnp.where(keep_p1, jnp.roll(xb, -1, axis=1), 0.0)  # x[l+1]
        base = b * seq                           # static lane offset
        cols_ref[0 * C_IN_PAD:0 * C_IN_PAD + c_in, base:base + seq] = x_m1
        cols_ref[1 * C_IN_PAD:1 * C_IN_PAD + c_in, base:base + seq] = xb
        cols_ref[2 * C_IN_PAD:2 * C_IN_PAD + c_in, base:base + seq] = x_p1

    # Single MXU matmul over the sublane-aligned im2col block, then the folded
    # BN shift + ReLU epilogue.
    acc = jnp.dot(w_ref[...], cols_ref[...], preferred_element_type=F32)
    out = jnp.maximum(acc + sh_ref[...], 0.0)    # (C_out, B*L)

    for b in range(batch):
        o_ref[b] = out[:, b * seq:(b + 1) * seq]   # full (C_out, L) tile stores


# ================================= wrapper ===================================
def basic_block(x, conv_w, conv_b, gamma, beta, running_mean, running_var):
    """x: (B, C_in, L) float32  ->  (B, C_out, L) float32 (eval-mode BN)."""
    batch, c_in, seq = x.shape
    c_out = conv_w.shape[0]

    # Fold conv bias + eval-mode BatchNorm into a per-channel shift, and fold
    # the BN scale directly into the conv weight (weight-prep only; no per-call
    # work on the activation path).
    scale = gamma / jnp.sqrt(running_var + EPS)
    shift = beta - running_mean * scale + conv_b * scale

    # (C_out, C_in, K) -> (C_out, K, C_in) -> pad C_in to 8 -> (C_out, K*8).
    # Column index = k*C_IN_PAD + c, matching the im2col row layout.
    w_scaled = conv_w * scale[:, None, None]
    w_taps = jnp.transpose(w_scaled, (0, 2, 1))                   # (C_out, K, C_in)
    w_taps = jnp.pad(w_taps, ((0, 0), (0, 0), (0, C_IN_PAD - c_in)))
    w2d = w_taps.reshape(c_out, K_SIZE * C_IN_PAD)                # (C_out, 24)

    return pl.pallas_call(
        basic_block_kernel,
        out_shape=jax.ShapeDtypeStruct((batch, c_out, seq), F32),
        grid=(1,),
        in_specs=[
            pl.BlockSpec((batch, c_in, seq), lambda i: (0, 0, 0)),
            pl.BlockSpec((c_out, K_SIZE * C_IN_PAD), lambda i: (0, 0)),
            pl.BlockSpec((c_out, 1), lambda i: (0, 0)),
        ],
        out_specs=pl.BlockSpec((batch, c_out, seq), lambda i: (0, 0, 0)),
        scratch_shapes=[pltpu.VMEM((K_SIZE * C_IN_PAD, batch * seq), F32)],
        compiler_params=pltpu.CompilerParams(
            dimension_semantics=("arbitrary",)),
    )(x, w2d, shift.reshape(-1, 1))


# =================================== main ====================================
if __name__ == "__main__":
    key = jax.random.PRNGKey(0)
    kx, kw, kb, kg, kbe, km, kv = jax.random.split(key, 7)

    x = jax.random.normal(kx, (BATCH, C_IN, SEQ_LEN), dtype=F32)
    conv_w = (jax.random.normal(kw, (C_OUT, C_IN, K_SIZE), dtype=F32)
              / np.sqrt(C_IN * K_SIZE)).astype(F32)
    conv_b = 0.1 * jax.random.normal(kb, (C_OUT,), dtype=F32)
    gamma = 1.0 + 0.1 * jax.random.normal(kg, (C_OUT,), dtype=F32)
    beta = 0.1 * jax.random.normal(kbe, (C_OUT,), dtype=F32)
    running_mean = 0.1 * jax.random.normal(km, (C_OUT,), dtype=F32)
    running_var = 0.8 + jnp.abs(0.2 * jax.random.normal(kv, (C_OUT,), dtype=F32))

    out = jax.jit(basic_block)(x, conv_w, conv_b, gamma, beta,
                               running_mean, running_var)
    out = jax.block_until_ready(out)

    # Independent pure-XLA reference (eval-mode BasicBlock semantics).
    y = lax.conv_general_dilated(x, conv_w, window_strides=(1,),
                                 padding=((1, 1),),
                                 dimension_numbers=("NCH", "OIH", "NCH"))
    y = y + conv_b[None, :, None]
    sc = (gamma / jnp.sqrt(running_var + EPS))[None, :, None]
    ref = jnp.maximum((y - running_mean[None, :, None]) * sc
                      + beta[None, :, None], 0.0)

    assert out.shape == (BATCH, C_OUT, SEQ_LEN)
    assert bool(jnp.all(jnp.isfinite(out)))
    err = float(jnp.max(jnp.abs(out - ref)))
    assert err < 1e-4, f"mismatch vs XLA reference: max abs err = {err}"
    print("KERNEL_OK")
</pallas_src>

<mosaic_0001>
module attributes {stable_mosaic.version = 11 : i64} {
  func.func @basic_block_kernel(%arg0: i32, %arg1: memref<2x4x128xf32, #tpu.memory_space<vmem>>, %arg2: memref<32x24xf32, #tpu.memory_space<vmem>>, %arg3: memref<32x1xf32, #tpu.memory_space<vmem>>, %arg4: memref<2x32x128xf32, #tpu.memory_space<vmem>>, %arg5: memref<24x256xf32, #tpu.memory_space<vmem>>) attributes {dimension_semantics = [#tpu.dimension_semantics<arbitrary>], iteration_bounds = array<i64: 1>, scalar_prefetch = 0 : i64, scratch_operands = 1 : i64, tpu.core_type = #tpu.core_type<tc>, window_params = [{pipeline_mode = #tpu.pipeline_mode<synchronous>, transform_indices = @transform_0, window_bounds = array<i64: 2, 4, 128>}, {pipeline_mode = #tpu.pipeline_mode<synchronous>, transform_indices = @transform_1, window_bounds = array<i64: 32, 24>}, {pipeline_mode = #tpu.pipeline_mode<synchronous>, transform_indices = @transform_2, window_bounds = array<i64: 32, 1>}, {pipeline_mode = #tpu.pipeline_mode<synchronous>, transform_indices = @transform_3, window_bounds = array<i64: 2, 32, 128>}]} {
    %0 = tpu.iota {dimensions = array<i32: 1>} : vector<4x128xi32>
    %c0_i32 = arith.constant 0 : i32
    %1 = vector.broadcast %c0_i32 : i32 to vector<4x128xi32>
    %2 = arith.cmpi ne, %0, %1 : vector<4x128xi32>
    %c127_i32 = arith.constant 127 : i32
    %3 = vector.broadcast %c127_i32 : i32 to vector<4x128xi32>
    %4 = arith.cmpi ne, %0, %3 : vector<4x128xi32>
    %cst = arith.constant 0.000000e+00 : f32
    %5 = vector.broadcast %cst : f32 to vector<24x256xf32>
    %c0 = arith.constant 0 : index
    %c0_0 = arith.constant 0 : index
    %6 = vector.load %arg5[%c0, %c0_0] : memref<24x256xf32, #tpu.memory_space<vmem>>, vector<24x256xf32>
    tpu.vector_store %arg5[%c0, %c0_0], %5 {strides = array<i32>} : memref<24x256xf32, #tpu.memory_space<vmem>>, vector<24x256xf32>,
    %c0_1 = arith.constant 0 : index
    %c0_2 = arith.constant 0 : index
    %c0_3 = arith.constant 0 : index
    %7 = vector.load %arg1[%c0_1, %c0_2, %c0_3] : memref<2x4x128xf32, #tpu.memory_space<vmem>>, vector<1x4x128xf32>
    %8 = vector.shape_cast %7 : vector<1x4x128xf32> to vector<4x128xf32>
    %9 = vector.extract_strided_slice %8 {offsets = [0, 127], sizes = [4, 1], strides = [1, 1]} : vector<4x128xf32> to vector<4x1xf32>
    %10 = vector.extract_strided_slice %8 {offsets = [0, 0], sizes = [4, 127], strides = [1, 1]} : vector<4x128xf32> to vector<4x127xf32>
    %11 = tpu.concatenate %9, %10 in 1 : vector<4x1xf32>, vector<4x127xf32> -> vector<4x128xf32>
    %cst_4 = arith.constant 0.000000e+00 : f32
    %12 = vector.broadcast %cst_4 : f32 to vector<4x128xf32>
    %13 = arith.select %2, %11, %12 : vector<4x128xi1>, vector<4x128xf32>
    %14 = vector.extract_strided_slice %8 {offsets = [0, 1], sizes = [4, 127], strides = [1, 1]} : vector<4x128xf32> to vector<4x127xf32>
    %15 = vector.extract_strided_slice %8 {offsets = [0, 0], sizes = [4, 1], strides = [1, 1]} : vector<4x128xf32> to vector<4x1xf32>
    %16 = tpu.concatenate %14, %15 in 1 : vector<4x127xf32>, vector<4x1xf32> -> vector<4x128xf32>
    %cst_5 = arith.constant 0.000000e+00 : f32
    %17 = vector.broadcast %cst_5 : f32 to vector<4x128xf32>
    %18 = arith.select %4, %16, %17 : vector<4x128xi1>, vector<4x128xf32>
    %c0_6 = arith.constant 0 : index
    %c0_7 = arith.constant 0 : index
    %19 = vector.load %arg5[%c0_6, %c0_7] : memref<24x256xf32, #tpu.memory_space<vmem>>, vector<4x128xf32>
    tpu.vector_store %arg5[%c0_6, %c0_7], %13 {strides = array<i32>} : memref<24x256xf32, #tpu.memory_space<vmem>>, vector<4x128xf32>,
    %c8 = arith.constant 8 : index
    %c0_8 = arith.constant 0 : index
    %20 = vector.load %arg5[%c8, %c0_8] : memref<24x256xf32, #tpu.memory_space<vmem>>, vector<4x128xf32>
    tpu.vector_store %arg5[%c8, %c0_8], %8 {strides = array<i32>} : memref<24x256xf32, #tpu.memory_space<vmem>>, vector<4x128xf32>,
    %c16 = arith.constant 16 : index
    %c0_9 = arith.constant 0 : index
    %21 = vector.load %arg5[%c16, %c0_9] : memref<24x256xf32, #tpu.memory_space<vmem>>, vector<4x128xf32>
    tpu.vector_store %arg5[%c16, %c0_9], %18 {strides = array<i32>} : memref<24x256xf32, #tpu.memory_space<vmem>>, vector<4x128xf32>,
    %c1 = arith.constant 1 : index
    %c0_10 = arith.constant 0 : index
    %c0_11 = arith.constant 0 : index
    %22 = vector.load %arg1[%c1, %c0_10, %c0_11] : memref<2x4x128xf32, #tpu.memory_space<vmem>>, vector<1x4x128xf32>
    %23 = vector.shape_cast %22 : vector<1x4x128xf32> to vector<4x128xf32>
    %24 = vector.extract_strided_slice %23 {offsets = [0, 127], sizes = [4, 1], strides = [1, 1]} : vector<4x128xf32> to vector<4x1xf32>
    %25 = vector.extract_strided_slice %23 {offsets = [0, 0], sizes = [4, 127], strides = [1, 1]} : vector<4x128xf32> to vector<4x127xf32>
    %26 = tpu.concatenate %24, %25 in 1 : vector<4x1xf32>, vector<4x127xf32> -> vector<4x128xf32>
    %cst_12 = arith.constant 0.000000e+00 : f32
    %27 = vector.broadcast %cst_12 : f32 to vector<4x128xf32>
    %28 = arith.select %2, %26, %27 : vector<4x128xi1>, vector<4x128xf32>
    %29 = vector.extract_strided_slice %23 {offsets = [0, 1], sizes = [4, 127], strides = [1, 1]} : vector<4x128xf32> to vector<4x127xf32>
    %30 = vector.extract_strided_slice %23 {offsets = [0, 0], sizes = [4, 1], strides = [1, 1]} : vector<4x128xf32> to vector<4x1xf32>
    %31 = tpu.concatenate %29, %30 in 1 : vector<4x127xf32>, vector<4x1xf32> -> vector<4x128xf32>
    %cst_13 = arith.constant 0.000000e+00 : f32
    %32 = vector.broadcast %cst_13 : f32 to vector<4x128xf32>
    %33 = arith.select %4, %31, %32 : vector<4x128xi1>, vector<4x128xf32>
    %c0_14 = arith.constant 0 : index
    %c128 = arith.constant 128 : index
    %34 = vector.load %arg5[%c0_14, %c128] : memref<24x256xf32, #tpu.memory_space<vmem>>, vector<4x128xf32>
    tpu.vector_store %arg5[%c0_14, %c128], %28 {strides = array<i32>} : memref<24x256xf32, #tpu.memory_space<vmem>>, vector<4x128xf32>,
    %c8_15 = arith.constant 8 : index
    %c128_16 = arith.constant 128 : index
    %35 = vector.load %arg5[%c8_15, %c128_16] : memref<24x256xf32, #tpu.memory_space<vmem>>, vector<4x128xf32>
    tpu.vector_store %arg5[%c8_15, %c128_16], %23 {strides = array<i32>} : memref<24x256xf32, #tpu.memory_space<vmem>>, vector<4x128xf32>,
    %c16_17 = arith.constant 16 : index
    %c128_18 = arith.constant 128 : index
    %36 = vector.load %arg5[%c16_17, %c128_18] : memref<24x256xf32, #tpu.memory_space<vmem>>, vector<4x128xf32>
    tpu.vector_store %arg5[%c16_17, %c128_18], %33 {strides = array<i32>} : memref<24x256xf32, #tpu.memory_space<vmem>>, vector<4x128xf32>,
    %c0_19 = arith.constant 0 : index
    %c0_20 = arith.constant 0 : index
    %37 = vector.load %arg2[%c0_19, %c0_20] : memref<32x24xf32, #tpu.memory_space<vmem>>, vector<32x24xf32>
    %c0_21 = arith.constant 0 : index
    %c0_22 = arith.constant 0 : index
    %38 = vector.load %arg5[%c0_21, %c0_22] : memref<24x256xf32, #tpu.memory_space<vmem>>, vector<24x256xf32>
    %cst_23 = arith.constant dense<0.000000e+00> : vector<32x256xf32>
    %39 = tpu.matmul %37, %38, %cst_23 {dimension_numbers = #tpu.dot_dimension_numbers<[1], [0], [0], [1], [0, 0, 1, 1], [], []>} : vector<32x24xf32>, vector<24x256xf32>, vector<32x256xf32> -> vector<32x256xf32>
    %c0_24 = arith.constant 0 : index
    %c0_25 = arith.constant 0 : index
    %40 = vector.load %arg3[%c0_24, %c0_25] : memref<32x1xf32, #tpu.memory_space<vmem>>, vector<32x1xf32>
    %41 = vector.broadcast %40 : vector<32x1xf32> to vector<32x256xf32>
    %42 = arith.addf %39, %41 : vector<32x256xf32>
    %cst_26 = arith.constant 0.000000e+00 : f32
    %43 = vector.broadcast %cst_26 : f32 to vector<32x256xf32>
    %44 = arith.maximumf %42, %43 : vector<32x256xf32>
    %45 = vector.extract_strided_slice %44 {offsets = [0, 0], sizes = [32, 128], strides = [1, 1]} : vector<32x256xf32> to vector<32x128xf32>
    %c0_27 = arith.constant 0 : index
    %c0_28 = arith.constant 0 : index
    %c0_29 = arith.constant 0 : index
    %46 = vector.load %arg4[%c0_27, %c0_28, %c0_29] : memref<2x32x128xf32, #tpu.memory_space<vmem>>, vector<1x32x128xf32>
    %47 = vector.shape_cast %46 : vector<1x32x128xf32> to vector<32x128xf32>
    %48 = vector.shape_cast %45 : vector<32x128xf32> to vector<1x32x128xf32>
    tpu.vector_store %arg4[%c0_27, %c0_28, %c0_29], %48 {strides = array<i32>} : memref<2x32x128xf32, #tpu.memory_space<vmem>>, vector<1x32x128xf32>,
    %49 = vector.extract_strided_slice %44 {offsets = [0, 128], sizes = [32, 128], strides = [1, 1]} : vector<32x256xf32> to vector<32x128xf32>
    %c1_30 = arith.constant 1 : index
    %c0_31 = arith.constant 0 : index
    %c0_32 = arith.constant 0 : index
    %50 = vector.load %arg4[%c1_30, %c0_31, %c0_32] : memref<2x32x128xf32, #tpu.memory_space<vmem>>, vector<1x32x128xf32>
    %51 = vector.shape_cast %50 : vector<1x32x128xf32> to vector<32x128xf32>
    %52 = vector.shape_cast %49 : vector<32x128xf32> to vector<1x32x128xf32>
    tpu.vector_store %arg4[%c1_30, %c0_31, %c0_32], %52 {strides = array<i32>} : memref<2x32x128xf32, #tpu.memory_space<vmem>>, vector<1x32x128xf32>,
    return
  }
  func.func @transform_0(%arg0: i32) -> (i32, i32, i32) {
    %c0_i32 = arith.constant 0 : i32
    %c0_i32_0 = arith.constant 0 : i32
    %c0_i32_1 = arith.constant 0 : i32
    %c0_i32_2 = arith.constant 0 : i32
    return %c0_i32, %c0_i32_0, %c0_i32_1 : i32, i32, i32
  }
  func.func @transform_1(%arg0: i32) -> (i32, i32) {
    %c0_i32 = arith.constant 0 : i32
    %c0_i32_0 = arith.constant 0 : i32
    %c0_i32_1 = arith.constant 0 : i32
    return %c0_i32, %c0_i32_0 : i32, i32
  }
  func.func @transform_2(%arg0: i32) -> (i32, i32) {
    %c0_i32 = arith.constant 0 : i32
    %c0_i32_0 = arith.constant 0 : i32
    %c0_i32_1 = arith.constant 0 : i32
    return %c0_i32, %c0_i32_0 : i32, i32
  }
  func.func @transform_3(%arg0: i32) -> (i32, i32, i32) {
    %c0_i32 = arith.constant 0 : i32
    %c0_i32_0 = arith.constant 0 : i32
    %c0_i32_1 = arith.constant 0 : i32
    %c0_i32_2 = arith.constant 0 : i32
    return %c0_i32, %c0_i32_0, %c0_i32_1 : i32, i32, i32
  }
}

</mosaic_0001>

<bundles_post_ra>
// kernel: basic_block.1
= control target key start
LH: loop header
LB: loop body
LE: loop exit
PB: predicated region body
PF: predicated region fallthrough
CT: control target
= control target key end

     0   :  { %s263_s14 = smov 127   ;;  %v264_v1 = vmov 0.0   ;;  %s265_s15 = smov 1   ;;  %s333_s0 = inlined_call_operand.vmem [shape: f32[2,4,128], index: 0, kind: input, shape index: {}]   ;;  %s334_s1 = inlined_call_operand.vmem [shape: f32[32,24], index: 1, kind: input, shape index: {}]   ;;  %s335_s2 = inlined_call_operand.vmem [shape: f32[32,1], index: 2, kind: input, shape index: {}]   ;;  %s336_s3 = inlined_call_operand.hbm [shape: f32[2,32,128], index: 3, kind: output, shape index: {}]  }
   0x1   :  { %v221_v0 = vld [vmem:[%s333_s0 + $0x4] sm:$0xf]  ;;  %22 = vst [vmem:[#allocation2] sm:$0xff] %v264_v1  ;;  %19 = vst [vmem:[#allocation2 + $0x28] sm:$0xff] %v264_v1  ;;  %v25_v2 = vld [vmem:[%s333_s0] sm:$0xf] }
   0x2   :  { %45 = vrot.lane.b32.xlu0 %v221_v0, %s263_s14  ;;  %20 = vst [vmem:[#allocation2 + $0x10] sm:$0xff] %v264_v1  ;;  %21 = vst [vmem:[#allocation2 + $0x8] sm:$0xff] %v264_v1  ;;  %41 = vrot.lane.b32.xlu1 %v221_v0, %s265_s15 }
   0x3   :  { %23 = vst [vmem:[#allocation2 + $0x18] sm:$0xff] %v264_v1  ;;  %24 = vst [vmem:[#allocation2 + $0x20] sm:$0xff] %v264_v1 }
   0x4   :  { %8 = vsyncpa [#allocation4], 0  ;;  %50 = vst [vmem:[#allocation2] sm:$0xf] %v221_v0  ;;  %163 = vmatprep.mubr.f32.mxu0 %v264_v1  ;;  %175 = vmatprep.mubr.f32.mxu1 %v264_v1  ;;  %v63_v3 = vld [vmem:[%s335_s2 + $0x8] sm:$0xff]  ;;  %v62_v4 = vld [vmem:[%s335_s2] sm:$0xff]  ;;  %v15_v8 = vlaneseq }
   0x5   :  { %36 = vst [vmem:[#allocation2 + $0x8] sm:$0xf] %v25_v2  ;;  %v266_v5 = vmov 0   ;;  %v64_v6 = vld [vmem:[%s335_s2 + $0x10] sm:$0xff]  ;;  %v65_v7 = vld [vmem:[%s335_s2 + $0x18] sm:$0xff]  ;;  %v52_v24 = vld [vmem:[%s334_s1] sm:$0xff] }
   0x6   :  { %31 = vrot.lane.b32.xlu0 %v25_v2, %s263_s14  ;;  %27 = vrot.lane.b32.xlu1 %v25_v2, %s265_s15  ;;  %v16_v9 = vand.u32 127, %v15_v8  ;;  %vm86_vm2 = vcmask 195584   ;;  %v54_v25 = vld [vmem:[%s334_s1 + $0x10] sm:$0xff]  ;;  %v53_v26 = vld [vmem:[%s334_s1 + $0x8] sm:$0xff] }
   0x7   :  { %240 = vset.pattern.permute.xlu1 %v266_v5  ;;  %239 = vset.pattern.permute.xlu0 %v266_v5  ;;  %v55_v27 = vld [vmem:[%s334_s1 + $0x18] sm:$0xff]  ;;  %s267_s1 = smov [#allocation3]  }
   0x8   :  { %vm18_vm0 = vcmp.ne.s32.totalorder %v16_v9, 127  ;;  %vm17_vm1 = vcmp.ne.s32.totalorder %v16_v9, 0  ;;  %s210_s5 = sshll.u32 %s267_s1, 4  ;;  %s211_s5 = int_to_ptr.vmem [resolvable:$true] %s210_s5 }
   0x9   :  { %s241_s6 = scalar_lea.vmem %s211_s5, 1024  ;;  %p246_p1 = scmp.lt.s32.totalorder %s211_s5, %s211_s5 }
   0xa   :  { %73 = vperm.xlu1 %240, %v63_v3   ;;  %68 = vperm.xlu0 %239, %v62_v4   ;;  %p242_p0 = scmp.ne.s32.totalorder %s211_s5, %s241_s6  ;;  %p247_p2 = scmp.lt.s32.totalorder %s241_s6, %s241_s6 }
   0xb   :  { %v59_v19 = vld [vmem:[#allocation2] sm:$0xff] }
   0xc   :  { %v58_v21 = vld [vmem:[#allocation2 + $0x8] sm:$0xff]  ;;  %p248_p3 = por %p247_p2, %p246_p1 }
   0xe   :  { %78 = vperm.xlu1 %240, %v64_v6   ;;  %83 = vperm.xlu0 %239, %v65_v7   ;;  %p249_p4 = pnand %p248_p3, %p242_p0 }
  0x74   :  { %v46_v10 = vpop.permute.xlu0 %45  ;;  %v42_v11 = vpop.permute.xlu1 %41 }
  0x75   :  { %v48_v12 = vsel %vm18_vm0, %v46_v10, 0.0  ;;  %v44_v13 = vsel %vm17_vm1, %v42_v11, 0.0 }
  0x76   :  { %51 = vst [vmem:[#allocation2 + $0x20] sm:$0xf] %v48_v12  ;;  %49 = vst [vmem:[#allocation2 + $0x10] sm:$0xf] %v44_v13 }
  0x78   :  { %v32_v14 = vpop.permute.xlu0 %31  ;;  %v28_v15 = vpop.permute.xlu1 %27 }
  0x79   :  { %v34_v16 = vsel %vm18_vm0, %v32_v14, 0.0  ;;  %v30_v17 = vsel %vm17_vm1, %v28_v15, 0.0 }
  0x7a   :  { %37 = vst [vmem:[#allocation2 + $0x18] sm:$0xf] %v34_v16  ;;  %35 = vst [vmem:[#allocation2 + $0x28] sm:$0xf] %v30_v17 }
  0x7d   :  { %v61_v18 = vld [vmem:[#allocation2 + $0x20] sm:$0xff]  ;;  %v57_v23 = vld [vmem:[#allocation2 + $0x10] sm:$0xff] }
  0x7e   :  { %125 = vmatprep.subr.mxu0 %v61_v18  ;;  %226 = vmatprep.subr.mxu1 %v61_v18 }
  0x81   :  { %v60_v20 = vld [vmem:[#allocation2 + $0x18] sm:$0xff]  ;;  %v56_v22 = vld [vmem:[#allocation2 + $0x28] sm:$0xff] }
  0x82   :  { %126 = vmatpush1.msra.mxu0 %v60_v20  ;;  %229 = vmatpush1.msra.mxu1 %v60_v20 }
  0x83   :  { %127 = vmatprep.subr.mxu0 %v59_v19  ;;  %227 = vmatprep.subr.mxu1 %v59_v19 }
  0x84   :  { %128 = vmatpush1.msra.mxu0 %v58_v21  ;;  %230 = vmatpush1.msra.mxu1 %v58_v21 }
  0x85   :  { %129 = vmatprep.subr.mxu0 %v57_v23  ;;  %228 = vmatprep.subr.mxu1 %v57_v23  ;;  %v74_v28 = vpop.permute.xlu1 %73  ;;  %v69_v29 = vpop.permute.xlu0 %68 }
  0x86   :  { %130 = vmatpush1.msra.mxu0 %v56_v22  ;;  %231 = vmatpush1.msra.mxu1 %v56_v22 }
  0x87   :  { %222 = vmatmul.mubr.msk.f32.vlgmr.msra.gmra.mxu0 %vm86_vm2, %v52_v24  ;;  %224 = vmatmul.mubr.msk.f32.vlgmr.msra.gmra.mxu1 %vm86_vm2, %v54_v25 }
  0x88   :  { %169 = vmatprep.mubr.f32.mxu0 %v264_v1  ;;  %181 = vmatprep.mubr.f32.mxu1 %v264_v1 }
  0x89   :  { %v79_v30 = vpop.permute.xlu1 %78  ;;  %v84_v39 = vpop.permute.xlu0 %83 }
  0x8b   :  { %223 = vmatmul.mubr.msk.f32.gmra.mxu0 %vm86_vm2, %v53_v26  ;;  %225 = vmatmul.mubr.msk.f32.gmra.mxu1 %vm86_vm2, %v55_v27 }
 0x147   :  { %v165_v31 = vpop.f32.mrf.mxu0  ;;  %v177_v32 = vpop.f32.mrf.mxu1 }
 0x148   :  { %v166_v33 = vadd.f32 %v165_v31, %v69_v29  ;;  %v178_v34 = vadd.f32 %v177_v32, %v79_v30 }
 0x149   :  { %v167_v35 = vpop.f32.mrf.mxu0  ;;  %v179_v36 = vpop.f32.mrf.mxu1 }
 0x14a   :  { %v188_v37 = vmax.f32 %v166_v33, 0.0  ;;  %v192_v38 = vmax.f32 %v178_v34, 0.0  ;;  %v168_v40 = vadd.f32 %v167_v35, %v69_v29  ;;  %v180_v41 = vadd.f32 %v179_v36, %v79_v30 }
 0x14b   :  { %v171_v42 = vpop.f32.mrf.mxu0  ;;  %v183_v43 = vpop.f32.mrf.mxu1 }
 0x14c   :  { %196 = vst [vmem:[#allocation3] sm:$0xff] %v188_v37  ;;  %198 = vst [vmem:[#allocation3 + $0x10] sm:$0xff] %v192_v38  ;;  %v189_v44 = vmax.f32 %v168_v40, 0.0  ;;  %v193_v45 = vmax.f32 %v180_v41, 0.0  ;;  %v172_v46 = vadd.f32 %v171_v42, %v74_v28  ;;  %v184_v47 = vadd.f32 %v183_v43, %v84_v39 }
 0x14d   :  { %v173_v48 = vpop.f32.mrf.mxu0  ;;  %v185_v49 = vpop.f32.mrf.mxu1 }
 0x14e   :  { %201 = vst [vmem:[#allocation3 + $0x20] sm:$0xff] %v189_v44  ;;  %203 = vst [vmem:[#allocation3 + $0x30] sm:$0xff] %v193_v45  ;;  %v190_v50 = vmax.f32 %v172_v46, 0.0  ;;  %v194_v51 = vmax.f32 %v184_v47, 0.0  ;;  %v174_v52 = vadd.f32 %v173_v48, %v74_v28  ;;  %v186_v53 = vadd.f32 %v185_v49, %v84_v39 }
 0x150   :  { %197 = vst [vmem:[#allocation3 + $0x8] sm:$0xff] %v190_v50  ;;  %199 = vst [vmem:[#allocation3 + $0x18] sm:$0xff] %v194_v51  ;;  %v191_v54 = vmax.f32 %v174_v52, 0.0  ;;  %v195_v55 = vmax.f32 %v186_v53, 0.0 }
 0x152   :  { %202 = vst [vmem:[#allocation3 + $0x28] sm:$0xff] %v191_v54  ;;  %204 = vst [vmem:[#allocation3 + $0x38] sm:$0xff] %v195_v55 }
 0x153   :  { %252 = shalt.err (!%p249_p4)
}
 0x154   :  { %s268_s7 = smov 128   ;;  %s269_s8 = smov 8  }
 0x155   :  { %216 = dma.vmem_to_hbm [thread:$0]  %s211_s5, 1024, %s336_s3, [#allocation4], %s268_s7, %s268_s7, %s269_s8  }
 0x156   :  { %261 = dma.done.wait [#allocation4], 1024  }
 0x157   :  { %262 = vsyncadd [#allocation4], 4294966272 }
 0x158   :  { %220 = vsyncpa [#allocation4], 1 }

</bundles_post_ra>
